<compile_context>
chip_gen: v7x
topology: tpu7x:2x2x1
jax: 0.10.0
libtpu: 0.0.40
codegen_flags: <defaults>
</compile_context>

<pallas_src>
import jax
import jax.numpy as jnp
from jax.experimental import pallas as pl
from jax.experimental.pallas import tpu as pltpu

LANE = 128
SUBLANE = 8


def _round_up(x, m):
    return (x + m - 1) // m * m


def _vmem_limit_bytes():
    """Generation-aware VMEM limit: ~75% of physical (v7x: 64 MiB, v5e/v6e: 128 MiB)."""
    try:
        cap = pltpu.get_tpu_info().vmem_capacity_bytes
    except Exception:
        cap = 64 << 20  # conservative fallback (v7x-sized)
    return max(16 << 20, min((cap * 3) // 4, 112 << 20))


def _choose_tm(n, v, vmem_limit):
    """Pick a row-tile size consistent with what the kernel actually allocates.

    Allocations: one single-buffered copy of the (V, V) table resident in VMEM,
    double-buffered (TM, V) logits output blocks, a few (TM, V) f32 temporaries
    (one-hot / exp / select), and tiny (TM, 1) idx / target / per-row-loss blocks.
    """
    v_lane = _round_up(v, LANE)      # lane-layout padding inside VMEM
    v_sub = _round_up(v, SUBLANE)
    table_bytes = v_sub * v_lane * 4                 # single copy (untiled VMEM input)
    per_row_bytes = 4 * (6 * v_lane + 24)            # 2x logits buf + ~4 temps + idx/tgt/loss
    avail = vmem_limit - table_bytes - (4 << 20)     # headroom for compiler scratch
    # TODO(synk): once the vocab table no longer fits in VMEM (large V), switch the
    # gather to a scalar-prefetch DMA row gather (table left in HBM via pl.ANY).
    avail = max(avail, per_row_bytes * SUBLANE)
    tm = int(avail // per_row_bytes)
    tm = max(SUBLANE, min(2048, (tm // SUBLANE) * SUBLANE))
    if tm >= n:
        return n          # single tile; block == full row extent is always legal
    return tm


def bigram_logits_kernel(idx_ref, emb_ref, logits_ref):
    """Inference path: embedding row gather as one-hot @ table on the MXU."""
    tm, v = logits_ref.shape
    lane_iota = jax.lax.broadcasted_iota(jnp.int32, (tm, v), 1)
    onehot = (idx_ref[...] == lane_iota).astype(jnp.float32)
    logits_ref[...] = jnp.dot(onehot, emb_ref[...],
                              preferred_element_type=jnp.float32)


def bigram_train_kernel(idx_ref, tgt_ref, emb_ref, logits_ref, loss_ref):
    """Training path: embedding gather + per-row cross-entropy (lse - target logit)."""
    tm, v = logits_ref.shape
    lane_iota = jax.lax.broadcasted_iota(jnp.int32, (tm, v), 1)
    onehot = (idx_ref[...] == lane_iota).astype(jnp.float32)
    logits = jnp.dot(onehot, emb_ref[...], preferred_element_type=jnp.float32)
    logits_ref[...] = logits

    # Max-stabilized logsumexp over the (unpadded) vocab axis.
    m = jnp.max(logits, axis=-1, keepdims=True)                      # (TM, 1)
    lse = m + jnp.log(jnp.sum(jnp.exp(logits - m), axis=-1, keepdims=True))
    # Target logit via select + reduce (no extra f32 one-hot temporary).
    tgt_logit = jnp.sum(jnp.where(tgt_ref[...] == lane_iota, logits, 0.0),
                        axis=-1, keepdims=True)                      # (TM, 1)
    # Per-row loss; rows past N in a ragged last tile are dropped on writeback.
    loss_ref[...] = lse - tgt_logit


def bigram_forward(indices, emb_table, targets=None):
    """Mirrors BigramModel.forward.

    indices: (B, T) int; emb_table: (V, V) float; targets: (B, T) int or None.
    Returns (logits, loss):
      - targets is None -> logits shape (B, T, V), loss None
      - targets given   -> logits shape (B*T, V),  loss scalar f32 (mean CE)
    """
    B, T = indices.shape
    V = emb_table.shape[0]
    N = B * T

    vmem_limit = _vmem_limit_bytes()
    TM = _choose_tm(N, V, vmem_limit)
    num_tiles = pl.cdiv(N, TM)

    emb = emb_table.astype(jnp.float32)
    idx_flat = indices.reshape(N, 1).astype(jnp.int32)

    row_spec = pl.BlockSpec((TM, 1), lambda i: (i, 0))
    # Grid-invariant table: untiled, VMEM-resident, single-buffered.
    emb_spec = pl.BlockSpec(memory_space=pltpu.MemorySpace.VMEM)
    logits_spec = pl.BlockSpec((TM, V), lambda i: (i, 0))

    # TODO(synk): on v7x use pltpu.CORE_PARALLEL on this axis to split row tiles
    # across the 2 TensorCores; kept "parallel" for portability across v5e/v6e/v7x.
    cparams = pltpu.CompilerParams(
        dimension_semantics=("parallel",),
        vmem_limit_bytes=int(vmem_limit))

    if targets is None:
        cost = pl.CostEstimate(
            flops=2 * N * V * V,
            transcendentals=0,
            bytes_accessed=N * 4 + V * V * 4 + N * V * 4)
        logits = pl.pallas_call(
            bigram_logits_kernel,
            out_shape=jax.ShapeDtypeStruct((N, V), jnp.float32),
            grid=(num_tiles,),
            in_specs=[row_spec, emb_spec],
            out_specs=logits_spec,
            compiler_params=cparams,
            cost_estimate=cost,
        )(idx_flat, emb)
        # (N, V) -> (B, T, V) is a contiguous split: metadata-only, no copy.
        return logits.reshape(B, T, V), None

    tgt_flat = targets.reshape(N, 1).astype(jnp.int32)
    cost = pl.CostEstimate(
        flops=2 * N * V * V + 6 * N * V,
        transcendentals=N * V,
        bytes_accessed=N * 4 + N * 4 + V * V * 4 + N * V * 4 + N * 4)
    logits, per_row_loss = pl.pallas_call(
        bigram_train_kernel,
        out_shape=(jax.ShapeDtypeStruct((N, V), jnp.float32),
                   jax.ShapeDtypeStruct((N, 1), jnp.float32)),
        grid=(num_tiles,),
        in_specs=[row_spec, row_spec, emb_spec],
        out_specs=(logits_spec, row_spec),
        compiler_params=cparams,
        cost_estimate=cost,
    )(idx_flat, tgt_flat, emb)

    loss = jnp.sum(per_row_loss) / N          # mean cross-entropy (F.cross_entropy default)
    return logits, loss                       # logits matches logits.view(B*T, C)


if __name__ == "__main__":
    B, T, V = 2, 8, 32

    key = jax.random.PRNGKey(0)
    k_emb, k_idx, k_tgt = jax.random.split(key, 3)

    # nn.Embedding(vocab_size, vocab_size) default init: N(0, 1)
    emb_table = jax.random.normal(k_emb, (V, V), dtype=jnp.float32)
    indices = jax.random.randint(k_idx, (B, T), 0, V, dtype=jnp.int32)
    targets = jax.random.randint(k_tgt, (B, T), 0, V, dtype=jnp.int32)

    # Path 1: with targets (logits (B*T, V), scalar loss)
    logits_flat, loss = bigram_forward(indices, emb_table, targets)
    jax.block_until_ready((logits_flat, loss))

    # Path 2: no targets (logits (B, T, V), loss None) — CE work skipped
    logits_btv, loss_none = bigram_forward(indices, emb_table, None)
    jax.block_until_ready(logits_btv)

    # Cross-check against plain-JAX reference.
    ref_logits = emb_table[indices.reshape(-1)]
    ref_lse = jax.scipy.special.logsumexp(ref_logits, axis=-1)
    ref_tgt = jnp.take_along_axis(
        ref_logits, targets.reshape(-1, 1), axis=-1)[:, 0]
    ref_loss = jnp.mean(ref_lse - ref_tgt)

    assert logits_flat.shape == (B * T, V)
    assert logits_btv.shape == (B, T, V)
    assert loss_none is None
    assert jnp.allclose(logits_flat, ref_logits, atol=1e-5)
    assert jnp.allclose(logits_btv.reshape(B * T, V), ref_logits, atol=1e-5)
    assert jnp.allclose(loss, ref_loss, atol=1e-5)

    print("KERNEL_OK")
</pallas_src>

<mosaic_0001>
module attributes {stable_mosaic.version = 11 : i64} {
  func.func @bigram_train_kernel(%arg0: i32, %arg1: memref<16x1xi32, #tpu.memory_space<vmem>>, %arg2: memref<16x1xi32, #tpu.memory_space<vmem>>, %arg3: memref<32x32xf32, #tpu.memory_space<vmem>>, %arg4: memref<16x32xf32, #tpu.memory_space<vmem>>, %arg5: memref<16x1xf32, #tpu.memory_space<vmem>>) attributes {dimension_semantics = [#tpu.dimension_semantics<parallel>], iteration_bounds = array<i64: 1>, scalar_prefetch = 0 : i64, scratch_operands = 0 : i64, tpu.core_type = #tpu.core_type<tc>, window_params = [{transform_indices = @transform_0, window_bounds = array<i64: 16, 1>}, {transform_indices = @transform_1, window_bounds = array<i64: 16, 1>}, {pipeline_mode = #tpu.pipeline_mode<synchronous>, transform_indices = @transform_2, window_bounds = array<i64: 32, 32>}, {transform_indices = @transform_3, window_bounds = array<i64: 16, 32>}, {transform_indices = @transform_4, window_bounds = array<i64: 16, 1>}]} {
    %0 = tpu.iota {dimensions = array<i32: 1>} : vector<16x32xi32>
    %c0 = arith.constant 0 : index
    %c0_0 = arith.constant 0 : index
    %1 = vector.load %arg1[%c0, %c0_0] : memref<16x1xi32, #tpu.memory_space<vmem>>, vector<16x1xi32>
    %2 = vector.broadcast %1 : vector<16x1xi32> to vector<16x32xi32>
    %3 = arith.cmpi eq, %2, %0 : vector<16x32xi32>
    %4 = arith.extui %3 : vector<16x32xi1> to vector<16x32xi32>
    %5 = arith.sitofp %4 : vector<16x32xi32> to vector<16x32xf32>
    %c0_1 = arith.constant 0 : index
    %c0_2 = arith.constant 0 : index
    %6 = vector.load %arg3[%c0_1, %c0_2] : memref<32x32xf32, #tpu.memory_space<vmem>>, vector<32x32xf32>
    %cst = arith.constant dense<0.000000e+00> : vector<16x32xf32>
    %7 = tpu.matmul %5, %6, %cst {dimension_numbers = #tpu.dot_dimension_numbers<[1], [0], [0], [1], [0, 0, 1, 1], [], []>} : vector<16x32xf32>, vector<32x32xf32>, vector<16x32xf32> -> vector<16x32xf32>
    %c0_3 = arith.constant 0 : index
    %c0_4 = arith.constant 0 : index
    %8 = vector.load %arg4[%c0_3, %c0_4] : memref<16x32xf32, #tpu.memory_space<vmem>>, vector<16x32xf32>
    tpu.vector_store %arg4[%c0_3, %c0_4], %7 {strides = array<i32>} : memref<16x32xf32, #tpu.memory_space<vmem>>, vector<16x32xf32>,
    %cst_5 = arith.constant dense<0xFF800000> : vector<16xf32>
    %9 = vector.multi_reduction <maximumf>, %7, %cst_5 [1] : vector<16x32xf32> to vector<16xf32>
    %10 = vector.shape_cast %9 : vector<16xf32> to vector<16x1xf32>
    %11 = vector.broadcast %10 : vector<16x1xf32> to vector<16x32xf32>
    %12 = arith.subf %7, %11 : vector<16x32xf32>
    %13 = math.exp %12 : vector<16x32xf32>
    %cst_6 = arith.constant dense<0.000000e+00> : vector<16xf32>
    %14 = vector.multi_reduction <add>, %13, %cst_6 [1] : vector<16x32xf32> to vector<16xf32>
    %15 = vector.shape_cast %14 : vector<16xf32> to vector<16x1xf32>
    %16 = math.log %15 : vector<16x1xf32>
    %17 = arith.addf %10, %16 : vector<16x1xf32>
    %c0_7 = arith.constant 0 : index
    %c0_8 = arith.constant 0 : index
    %18 = vector.load %arg2[%c0_7, %c0_8] : memref<16x1xi32, #tpu.memory_space<vmem>>, vector<16x1xi32>
    %19 = vector.broadcast %18 : vector<16x1xi32> to vector<16x32xi32>
    %20 = arith.cmpi eq, %19, %0 : vector<16x32xi32>
    %cst_9 = arith.constant 0.000000e+00 : f32
    %21 = vector.broadcast %cst_9 : f32 to vector<16x32xf32>
    %22 = arith.select %20, %7, %21 : vector<16x32xi1>, vector<16x32xf32>
    %cst_10 = arith.constant dense<0.000000e+00> : vector<16xf32>
    %23 = vector.multi_reduction <add>, %22, %cst_10 [1] : vector<16x32xf32> to vector<16xf32>
    %24 = vector.shape_cast %23 : vector<16xf32> to vector<16x1xf32>
    %25 = arith.subf %17, %24 : vector<16x1xf32>
    %c0_11 = arith.constant 0 : index
    %c0_12 = arith.constant 0 : index
    %26 = vector.load %arg5[%c0_11, %c0_12] : memref<16x1xf32, #tpu.memory_space<vmem>>, vector<16x1xf32>
    tpu.vector_store %arg5[%c0_11, %c0_12], %25 {strides = array<i32>} : memref<16x1xf32, #tpu.memory_space<vmem>>, vector<16x1xf32>,
    return
  }
  func.func @transform_0(%arg0: i32) -> (i32, i32) {
    %c0_i32 = arith.constant 0 : i32
    %c0_i32_0 = arith.constant 0 : i32
    return %arg0, %c0_i32 : i32, i32
  }
  func.func @transform_1(%arg0: i32) -> (i32, i32) {
    %c0_i32 = arith.constant 0 : i32
    %c0_i32_0 = arith.constant 0 : i32
    return %arg0, %c0_i32 : i32, i32
  }
  func.func @transform_2(%arg0: i32) -> (i32, i32) {
    %c0_i32 = arith.constant 0 : i32
    %c0_i32_0 = arith.constant 0 : i32
    %c0_i32_1 = arith.constant 0 : i32
    return %c0_i32, %c0_i32_0 : i32, i32
  }
  func.func @transform_3(%arg0: i32) -> (i32, i32) {
    %c0_i32 = arith.constant 0 : i32
    %c0_i32_0 = arith.constant 0 : i32
    return %arg0, %c0_i32 : i32, i32
  }
  func.func @transform_4(%arg0: i32) -> (i32, i32) {
    %c0_i32 = arith.constant 0 : i32
    %c0_i32_0 = arith.constant 0 : i32
    return %arg0, %c0_i32 : i32, i32
  }
}

</mosaic_0001>

<bundles_post_ra>
// kernel: tpu_custom_call.1
= control target key start
LH: loop header
LB: loop body
LE: loop exit
PB: predicated region body
PF: predicated region fallthrough
CT: control target
= control target key end

     0   :  { %v256_v1 = vmov 0   ;;  %s338_s0 = inlined_call_operand.vmem [shape: s32[16,1], index: 0, kind: input, shape index: {}]   ;;  %s339_s1 = inlined_call_operand.vmem [shape: s32[16,1], index: 1, kind: input, shape index: {}]   ;;  %s340_s2 = inlined_call_operand.vmem [shape: f32[32,32], index: 2, kind: input, shape index: {}]   ;;  %s341_s3 = inlined_call_operand.hbm [shape: f32[16,32], index: 3, kind: output, shape index: {0}]   ;;  %s342_s4 = inlined_call_operand.vmem [shape: f32[16,1], index: 4, kind: output, shape index: {1}]  }
   0x1   :  { %v19_v0 = vld [vmem:[%s338_s0] sm:$0xff]  ;;  %222 = vset.pattern.permute.xlu0 %v256_v1  ;;  %v34_v3 = vld [vmem:[%s340_s2 + $0x8] sm:$0xff]  ;;  %v35_v4 = vld [vmem:[%s340_s2 + $0x10] sm:$0xff]  ;;  %223 = vset.pattern.permute.xlu1 %v256_v1 }
   0x2   :  { %v33_v2 = vld [vmem:[%s340_s2] sm:$0xff]  ;;  %22 = vperm.xlu0 %222, %v19_v0   ;;  %v36_v6 = vld [vmem:[%s340_s2 + $0x18] sm:$0xff] }
   0x3   :  { %v209_v5 = vpack.c.bf16 %v34_v3, %v33_v2 }
   0x4   :  { %10 = vsyncpa [#allocation3], 0  ;;  %v20_v7 = vld [vmem:[%s338_s0 + $0x8] sm:$0xff]  ;;  %v213_v8 = vpack.c.bf16 %v36_v6, %v35_v4  ;;  %v145_v9 = vld [vmem:[%s339_s1] sm:$0xff]  ;;  %v17_v10 = vlaneseq  ;;  %vm37_vm0 = vcmask 261120   ;;  %v257_v13 = vmov 0.0  }
   0x5   :  { %210 = vmatprep.subr.bf16.mxu0 %v209_v5  ;;  %v146_v21 = vld [vmem:[%s339_s1 + $0x8] sm:$0xff]  ;;  %s258_s1 = smov [#allocation2]  }
   0x6   :  { %212 = vmatpush3.bf16.msra.mxu0 %v209_v5  ;;  %25 = vperm.xlu0 %222, %v20_v7   ;;  %v18_v11 = vand.u32 127, %v17_v10  ;;  %s173_s29 = sshll.u32 %s258_s1, 4  ;;  %s174_s29 = int_to_ptr.vmem [resolvable:$true] %s173_s29 }
   0x7   :  { %214 = vmatprep.subr.bf16.mxu0 %v213_v8  ;;  %s232_s30 = scalar_lea.vmem %s174_s29, 256  ;;  %p237_p1 = scmp.lt.s32.totalorder %s174_s29, %s174_s29 }
   0x8   :  { %p233_p0 = scmp.ne.s32.totalorder %s174_s29, %s232_s30  ;;  %p238_p2 = scmp.lt.s32.totalorder %s232_s30, %s232_s30 }
   0xa   :  { %216 = vmatpush3.bf16.msra.mxu0 %v213_v8  ;;  %148 = vperm.xlu0 %222, %v145_v9   ;;  %p239_p3 = por %p238_p2, %p237_p1 }
   0xc   :  { %p240_p4 = pnand %p239_p3, %p233_p0 }
  0x81   :  { %v23_v12 = vpop.permute.xlu0 %22 }
  0x82   :  { %vm27_vm1 = vcmp.eq.s32.totalorder %v23_v12, %v18_v11 }
  0x83   :  { %v188_v14 = vsel %vm27_vm1, 1.0, %v257_v13 }
  0x84   :  { %206 = vmatprep.mubr.msk.f32.mxu0 %vm37_vm0, %v188_v14 }
  0x85   :  { %v26_v15 = vpop.permute.xlu0 %25 }
  0x86   :  { %vm28_vm2 = vcmp.eq.s32.totalorder %v26_v15, %v18_v11 }
  0x87   :  { %v189_v16 = vsel %vm28_vm2, 1.0, %v257_v13 }
  0x88   :  { %207 = vmatmul.mubr.msk.f32.vlgmr.msra.gmra.mrb[0].mxu0 %vm37_vm0, %v189_v16 }
  0x89   :  { %v149_v30 = vpop.permute.xlu0 %148 }
  0x8a   :  { %vm153_vm3 = vcmp.eq.s32.totalorder %v149_v30, %v18_v11 }
 0x15b   :  { %v208_v17 = vpop.f32.mrb[0].mxu0 }
 0x15c   :  { %120 = vst.msk [vmem:[#allocation2 + $0x8] sm:$0xff] %vm37_vm0, %v208_v17  ;;  %v110_v18 = vpop.f32.mrb[1].mxu0  ;;  %v124_v19 = vsel %vm37_vm0, %v208_v17, -inf }
 0x15d   :  { %119 = vst.msk [vmem:[#allocation2] sm:$0xff] %vm37_vm0, %v110_v18  ;;  %125 = vmax.xlane.f32.xlu1 %v124_v19  ;;  %v121_v20 = vsel %vm37_vm0, %v110_v18, -inf  ;;  %v155_v34 = vsel %vm153_vm3, %v110_v18, 0.0 }
 0x15e   :  { %v157_v35 = vsel %vm37_vm0, %v155_v34, 0.0 }
 0x161   :  { %122 = vmax.xlane.f32.xlu1 %v121_v20 }
 0x172   :  { %151 = vperm.xlu1 %223, %v146_v21  }
 0x1ea   :  { %v126_v22 = vpop.xlane.xlu1 %125 }
 0x1eb   :  { %v128_v23 = vsub.f32 %v208_v17, %v126_v22 }
 0x1ed   :  { %v131_v24 = vmul.f32 1.442695, %v128_v23 }
 0x1ee   :  { %v123_v25 = vpop.xlane.xlu1 %122 }
 0x1ef   :  { %224 = vpow2.f32 %v131_v24  ;;  %v127_v26 = vsub.f32 %v110_v18, %v123_v25 }
 0x1f1   :  { %v129_v27 = vmul.f32 1.442695, %v127_v26 }
 0x1f2   :  { %v152_v32 = vpop.permute.xlu1 %151 }
 0x1f3   :  { %226 = vpow2.f32 %v129_v27  ;;  %vm154_vm4 = vcmp.eq.s32.totalorder %v152_v32, %v18_v11 }
 0x1f4   :  { %v156_v36 = vsel %vm154_vm4, %v208_v17, 0.0 }
 0x1f5   :  { %v160_v37 = vsel %vm37_vm0, %v156_v36, 0.0 }
 0x1f9   :  { %v225_v28 = vpop.eup %224 }
 0x1fa   :  { %v136_v29 = vsel %vm37_vm0, %v225_v28, 0.0 }
 0x1fb   :  { %137 = vadd.xlane.f32.xlu1 %v136_v29 }
 0x1fd   :  { %v227_v31 = vpop.eup %226 }
 0x1fe   :  { %v133_v33 = vsel %vm37_vm0, %v227_v31, 0.0 }
 0x1ff   :  { %134 = vadd.xlane.f32.xlu0 %v133_v33 }
 0x203   :  { %158 = vadd.xlane.f32.xlu0 %v157_v35 }
 0x207   :  { %161 = vadd.xlane.f32.xlu0 %v160_v37 }
 0x208   :  { %243 = shalt.err (!%p240_p4)
}
 0x209   :  { %s244_s7 = scalar_lea.hbm %s341_s3, 256 }
 0x20a   :  { %p245_p5 = scmp.ne.s32.totalorder %s341_s3, %s244_s7  ;;  %p248_p6 = scmp.lt.u32.totalorder %s244_s7, %s341_s3 }
 0x20c   :  { %p250_p7 = pnand %p248_p6, %p245_p5 }
 0x20e   :  { %253 = shalt.err (!%p250_p7)
}
 0x20f   :  { %s259_s12 = smov 128   ;;  %s260_s13 = smov 8   ;;  %vm165_vm5 = vcmask 7168  }
 0x210   :  { %179 = dma.vmem_to_hbm [thread:$0]  %s174_s29, 256, %s341_s3, [#allocation3], %s259_s12, %s259_s12, %s260_s13  }
 0x288   :  { %v138_v38 = vpop.xlane.xlu1 %137 }
 0x289   :  { %228 = vlog2.f32 %v138_v38 }
 0x28c   :  { %v135_v39 = vpop.xlane.xlu0 %134 }
 0x28d   :  { %230 = vlog2.f32 %v135_v39 }
 0x290   :  { %v159_v40 = vpop.xlane.xlu0 %158 }
 0x293   :  { %v229_v41 = vpop.eup %228 }
 0x294   :  { %v142_v42 = vmul.f32 0.6931472, %v229_v41  ;;  %v162_v45 = vpop.xlane.xlu0 %161 }
 0x296   :  { %v144_v43 = vadd.f32 %v142_v42, %v126_v22 }
 0x297   :  { %v231_v44 = vpop.eup %230 }
 0x298   :  { %v140_v46 = vmul.f32 0.6931472, %v231_v44  ;;  %v164_v47 = vsub.f32 %v144_v43, %v162_v45 }
 0x29a   :  { %v143_v48 = vadd.f32 %v140_v46, %v123_v25  ;;  %167 = vst.msk [vmem:[%s342_s4 + $0x8] sm:$0xff] %vm165_vm5, %v164_v47 }
 0x29c   :  { %v163_v49 = vsub.f32 %v143_v48, %v159_v40 }
 0x29e   :  { %166 = vst.msk [vmem:[%s342_s4] sm:$0xff] %vm165_vm5, %v163_v49 }
 0x29f   :  { %254 = dma.done.wait [#allocation3], 256  }
 0x2a0   :  { %255 = vsyncadd [#allocation3], 4294967040 }
 0x2a1   :  { %187 = vsyncpa [#allocation3], 1 }

</bundles_post_ra>
